<compile_context>
chip_gen: v7x
topology: tpu7x:2x2x1
jax: 0.10.0
libtpu: 0.0.40
codegen_flags: <defaults>
</compile_context>

<pallas_src>
import numpy as np
import jax
import jax.numpy as jnp
from jax.experimental import pallas as pl
from jax.experimental.pallas import tpu as pltpu

OUTSIZES = (9, 25, 64)  # np.array([9, 25, 64]) in the PyTorch module


def adaptive_pool_matrix_np(l_in: int, l_out: int) -> np.ndarray:
    """(l_in, l_out) matrix such that x @ P == AdaptiveAvgPool1d(l_out)(x)."""
    idx = np.arange(l_out)
    starts = (idx * l_in) // l_out
    ends = -((-(idx + 1) * l_in) // l_out)  # ceil((i+1)*l_in / l_out)
    p = np.zeros((l_in, l_out), np.float32)
    for i in range(l_out):
        p[starts[i]:ends[i], i] = 1.0 / float(ends[i] - starts[i])
    return p


def concat_pool_matrix_np(l_in: int) -> np.ndarray:
    """(l_in, sum(OUTSIZES)) concatenated pool operator (pure constant, built in numpy)."""
    return np.concatenate([adaptive_pool_matrix_np(l_in, o) for o in OUTSIZES], axis=1)


def multi_adapt_pool_kernel(x_ref, q_ref, b_ref, out_ref):
    # x_ref:   (TN, C*L)        row tile of the flattened input
    # q_ref:   (C*L, LANES_PAD) fused pool + 1x1-conv operator (resident across grid)
    # b_ref:   (1,  LANES_PAD)  bias row (resident across grid)
    # out_ref: (TN, LANES_PAD)  lane-dense output slab
    out_ref[...] = (
        jnp.dot(x_ref[...], q_ref[...], preferred_element_type=jnp.float32)
        + b_ref[...]
    ).astype(out_ref.dtype)


def multi_adapt_pooling(x, w, b, *, row_tile=512, matmul_dtype=jnp.float32):
    n, c, l_in = x.shape
    c_out = w.shape[0]
    o_total = sum(OUTSIZES)                          # 98
    lanes = c_out * o_total                          # total output lanes (unpadded)
    lanes_pad = ((lanes + 127) // 128) * 128         # pad total lanes to a 128 multiple

    # ---- one-time XLA glue: fused pool+conv operator Q and padded bias row ----
    p_cat = jnp.asarray(concat_pool_matrix_np(l_in))                    # constant (L, 98)
    q = jnp.einsum("dc,lj->cldj", w.astype(jnp.float32), p_cat)         # (C, L, Cout, 98)
    q = q.reshape(c * l_in, lanes)
    q = jnp.pad(q, ((0, 0), (0, lanes_pad - lanes)))                    # (C*L, LANES_PAD)
    bias = jnp.broadcast_to(b.astype(jnp.float32)[:, None], (c_out, o_total))
    bias = jnp.pad(bias.reshape(1, lanes), ((0, 0), (0, lanes_pad - lanes)))

    x_flat = x.reshape(n, c * l_in).astype(jnp.float32)  # free contiguous reshape

    # Row tile: multiple of 8, <= row_tile; pad the batch so the grid always divides.
    tn = min(((row_tile + 7) // 8) * 8, max(8, ((n + 7) // 8) * 8))
    n_pad = ((n + tn - 1) // tn) * tn
    if n_pad != n:
        x_flat = jnp.pad(x_flat, ((0, n_pad - n), (0, 0)))

    if matmul_dtype != jnp.float32:  # optional bf16 input path (f32 accumulation)
        x_flat = x_flat.astype(matmul_dtype)
        q = q.astype(matmul_dtype)

    grid = (n_pad // tn,)
    k = c * l_in

    out = pl.pallas_call(
        multi_adapt_pool_kernel,
        out_shape=jax.ShapeDtypeStruct((n_pad, lanes_pad), jnp.float32),
        grid=grid,
        in_specs=[
            pl.BlockSpec((tn, k), lambda i: (i, 0)),          # x row tile (pipelined)
            pl.BlockSpec((k, lanes_pad), lambda i: (0, 0)),   # Q (resident across grid)
            pl.BlockSpec((1, lanes_pad), lambda i: (0, 0)),   # bias (resident across grid)
        ],
        out_specs=pl.BlockSpec((tn, lanes_pad), lambda i: (i, 0)),
        compiler_params=pltpu.CompilerParams(
            dimension_semantics=("parallel",)),  # megacore split on v7x
    )(x_flat, q, bias)

    # Un-pad (rows + lanes) and restore (N, Cout, 98) NCL layout in cheap XLA glue.
    return out[:n, :lanes].reshape(n, c_out, o_total).astype(x.dtype)


def reference(x, w, b):
    """Pure-JAX reference of the same forward pass (pool -> 1x1 conv + bias -> concat)."""
    outs = []
    l_in = x.shape[-1]
    for o in OUTSIZES:
        p = jnp.asarray(adaptive_pool_matrix_np(l_in, o))
        pooled = jnp.einsum("ncl,lo->nco", x, p)
        outs.append(jnp.einsum("dc,nco->ndo", w, pooled) + b[None, :, None])
    return jnp.concatenate(outs, axis=-1)


if __name__ == "__main__":
    key = jax.random.PRNGKey(0)
    kx, kw, kb = jax.random.split(key, 3)

    N, C, L = 13, 4, 128         # N=13 deliberately non-divisible -> exercises row padding
    C_OUT = 4                    # inner 1x1-conv keeps channel count

    x = jax.random.normal(kx, (N, C, L), jnp.float32)
    w = jax.random.normal(kw, (C_OUT, C), jnp.float32) * 0.1
    b = jax.random.normal(kb, (C_OUT,), jnp.float32) * 0.1

    # row_tile=8 just to exercise a multi-block pipelined grid (plus the padded last tile)
    # at demo size; the default (512) is the production tile.
    out = jax.block_until_ready(multi_adapt_pooling(x, w, b, row_tile=8))
    ref = reference(x, w, b)

    assert out.shape == (N, C_OUT, sum(OUTSIZES)), out.shape
    # Tolerance note: the fused single matmul accumulates in a different order than the
    # pool-then-conv reference; with the TPU's default matmul precision (bf16 MXU passes)
    # this shows up as ~1e-4-level numerical differences, not correctness bugs.
    np.testing.assert_allclose(np.asarray(out), np.asarray(ref),
                               rtol=2e-3, atol=2e-3)
    print("KERNEL_OK")
</pallas_src>

<mosaic_0001>
module attributes {stable_mosaic.version = 11 : i64} {
  func.func @multi_adapt_pool_kernel(%arg0: i32, %arg1: memref<8x512xf32, #tpu.memory_space<vmem>>, %arg2: memref<512x512xf32, #tpu.memory_space<vmem>>, %arg3: memref<1x512xf32, #tpu.memory_space<vmem>>, %arg4: memref<8x512xf32, #tpu.memory_space<vmem>>) attributes {dimension_semantics = [#tpu.dimension_semantics<parallel>], iteration_bounds = array<i64: 2>, scalar_prefetch = 0 : i64, scratch_operands = 0 : i64, tpu.core_type = #tpu.core_type<tc>, window_params = [{transform_indices = @transform_0, window_bounds = array<i64: 8, 512>}, {pipeline_mode = #tpu.pipeline_mode<synchronous>, transform_indices = @transform_1, window_bounds = array<i64: 512, 512>}, {pipeline_mode = #tpu.pipeline_mode<synchronous>, transform_indices = @transform_2, window_bounds = array<i64: 1, 512>}, {transform_indices = @transform_3, window_bounds = array<i64: 8, 512>}]} {
    %c0 = arith.constant 0 : index
    %c0_0 = arith.constant 0 : index
    %0 = vector.load %arg1[%c0, %c0_0] : memref<8x512xf32, #tpu.memory_space<vmem>>, vector<8x512xf32>
    %c0_1 = arith.constant 0 : index
    %c0_2 = arith.constant 0 : index
    %1 = vector.load %arg2[%c0_1, %c0_2] : memref<512x512xf32, #tpu.memory_space<vmem>>, vector<512x512xf32>
    %cst = arith.constant dense<0.000000e+00> : vector<8x512xf32>
    %2 = tpu.matmul %0, %1, %cst {dimension_numbers = #tpu.dot_dimension_numbers<[1], [0], [0], [1], [0, 0, 1, 1], [], []>} : vector<8x512xf32>, vector<512x512xf32>, vector<8x512xf32> -> vector<8x512xf32>
    %c0_3 = arith.constant 0 : index
    %c0_4 = arith.constant 0 : index
    %3 = vector.load %arg3[%c0_3, %c0_4] : memref<1x512xf32, #tpu.memory_space<vmem>>, vector<1x512xf32>
    %4 = vector.broadcast %3 : vector<1x512xf32> to vector<8x512xf32>
    %5 = arith.addf %2, %4 : vector<8x512xf32>
    %c0_5 = arith.constant 0 : index
    %c0_6 = arith.constant 0 : index
    %6 = vector.load %arg4[%c0_5, %c0_6] : memref<8x512xf32, #tpu.memory_space<vmem>>, vector<8x512xf32>
    tpu.vector_store %arg4[%c0_5, %c0_6], %5 {strides = array<i32>} : memref<8x512xf32, #tpu.memory_space<vmem>>, vector<8x512xf32>,
    return
  }
  func.func @transform_0(%arg0: i32) -> (i32, i32) {
    %c0_i32 = arith.constant 0 : i32
    %c0_i32_0 = arith.constant 0 : i32
    return %arg0, %c0_i32 : i32, i32
  }
  func.func @transform_1(%arg0: i32) -> (i32, i32) {
    %c0_i32 = arith.constant 0 : i32
    %c0_i32_0 = arith.constant 0 : i32
    %c0_i32_1 = arith.constant 0 : i32
    return %c0_i32, %c0_i32_0 : i32, i32
  }
  func.func @transform_2(%arg0: i32) -> (i32, i32) {
    %c0_i32 = arith.constant 0 : i32
    %c0_i32_0 = arith.constant 0 : i32
    %c0_i32_1 = arith.constant 0 : i32
    return %c0_i32, %c0_i32_0 : i32, i32
  }
  func.func @transform_3(%arg0: i32) -> (i32, i32) {
    %c0_i32 = arith.constant 0 : i32
    %c0_i32_0 = arith.constant 0 : i32
    return %arg0, %c0_i32 : i32, i32
  }
}

</mosaic_0001>

<bundles_post_ra>
// kernel: tpu_custom_call.1
= control target key start
LH: loop header
LB: loop body
LE: loop exit
PB: predicated region body
PF: predicated region fallthrough
CT: control target
= control target key end

     0   :  { %8 = vsyncpa [#allocation3], 0  ;;  %s1572_s0 = inlined_call_operand.hbm [shape: f32[16,512], index: 0, kind: input, shape index: {}]   ;;  %s1573_s1 = inlined_call_operand.hbm [shape: f32[512,512], index: 1, kind: input, shape index: {}]   ;;  %s1574_s2 = inlined_call_operand.vmem [shape: f32[1,512], index: 2, kind: input, shape index: {}]   ;;  %s1575_s3 = inlined_call_operand.hbm [shape: f32[16,512], index: 3, kind: output, shape index: {}]  }
   0x1   :  { %10 = vsyncpa [#allocation3 + $0x1], 0 }
   0x2   :  { %11 = vsyncpa [#allocation6], 0 }
   0x3   :  { %12 = vsyncpa [#allocation4], 0 }
   0x4   :  { %14 = vsyncpa [#allocation4 + $0x1], 0  ;;  %s1363_s12 = smov 0   ;;  %s1365_s13 = smov 0  }
   0x5   :  { %s1367_s14 = smov 0   ;;  %s1369_s15 = smov 0  }
   0x6 LB: > { %s1384_s16 = sadd.s32 4294967295, %s1336_s15   ;;  %s867_s17 = sadd.s32 4294967294, %s1336_s15   ;;  %s1336_s15 = sphi %s1369_s15, %s1595_s15   ;;  %s1332_s14 = sphi %s1367_s14, %s1594_s14   ;;  %s1328_s13 = sphi %s1365_s13, %s1593_s13   ;;  %s1324_s12 = sphi %s1363_s12, %s1592_s12  }
   0x7   : > { %p40_p0 = scmp.ne.s32.totalorder %s1328_s13, %s1324_s12  ;;  %p1576_p1 = scmp.eq.s32.totalorder %s1384_s16, 0 }
   0x8   : > { %p112_p3 = scmp.eq.s32.totalorder %s867_s17, 1  ;;  %p868_p5 = scmp.ge.s32.totalorder %s1336_s15, 1 }
   0x9   : > { %p1393_p4 = por %p1576_p1, %p40_p0  ;;  %p119_p7 = scmp.lt.s32.totalorder %s1336_s15, 3 }
   0xa   : > { %p1398_p6 = por %p112_p3, %p40_p0  ;;  %s1338_s21 = smov [#allocation5]  }
   0xb   : > { %s1579_s18 = scalar_select %p1393_p4, 1, 0 }
   0xc   : > { %s1580_s19 = scalar_select %p1398_p6, 1, 0 }
   0xd   : > { %p1403_p8 = pnand %p868_p5, %p119_p7  ;;  %s131_s22 = sshll.u32 %s1338_s21, 4  ;;  %s1407_s22 = int_to_ptr.vmem [resolvable:$true] %s131_s22 }
   0xe   : > { %s1419_s24 = sadd.s32 1, %s1336_s15   ;;  %s27_s25 = sadd.s32 1, %s1332_s14 }
   0xf   : > { %s1581_s20 = scalar_select %p1403_p8, 1, 0 }
  0x10   : > { %p1157_p9 = pneg %p1403_p8  ;;  %s24_s26 = ssub.s32 %s1336_s15, %s1419_s24 }
  0x11   : > { %s1208_s29 = scalar_lea.hbm %s1573_s1, 32768 }
  0x12   : > { %p1414_p11 = pnand %p1157_p9, %p1576_p1  ;;  %p1209_p12 = scmp.ne.s32.totalorder %s1573_s1, %s1208_s29 }
  0x13   : > { %p1215_p5 = scmp.lt.u32.totalorder %s1208_s29, %s1573_s1 }
  0x14   : > { %p1210_p13 = pneg %p1414_p11 }
  0x16   : > { %p1211_p0 = pnand %p1210_p13, %p1209_p12 }
  0x18   : > { %p1212_p3 = pneg %p1211_p0 }
  0x1a   : > { %p1217_p7 = pnand %p1215_p5, %p1212_p3 }
  0x1c   : > { %1220 = shalt.err (!%p1217_p7)
}
  0x1d   : > { %s1221_s7 = scalar_lea.vmem %s1407_s22, 32768  ;;  %p1229_p2 = scmp.lt.s32.totalorder %s1407_s22, %s1407_s22 }
  0x1e   : > { %p1222_p9 = scmp.ne.s32.totalorder %s1407_s22, %s1221_s7  ;;  %p1230_p6 = scmp.lt.s32.totalorder %s1221_s7, %s1221_s7 }
  0x20   : > { %p1224_p10 = pnand %p1222_p9, %p1210_p13  ;;  %p1231_p4 = por %p1230_p6, %p1229_p2 }
  0x22   : > { %p1225_p1 = pneg %p1224_p10 }
  0x24   : > { %p1232_p8 = pnand %p1231_p4, %p1225_p1 }
  0x26   : > { %1235 = shalt.err (!%p1232_p8)
}
  0x27   : > { %s1339_s8 = smov 512   ;;  %s1340_s9 = smov 32  }
  0x28   : > { %1160 = dma.hbm_to_vmem [thread:$0]  (!%p1414_p11), %s1573_s1, 32768, %s1407_s22, [#allocation6], %s1339_s8, %s1339_s8, %s1340_s9  }
  0x29   : > { %p25_p2 = scmp.eq.s32.totalorder %s24_s26, 0  ;;  %p34_p1 = scmp.ne.s32.totalorder %s1332_s14, %s1328_s13 }
  0x2a   : > { %p35_p4 = scmp.eq.s32.totalorder %s1336_s15, 0  ;;  %p1170_p6 = scmp.lt.s32.totalorder %s1336_s15, 2 }
  0x2b   : > { %s1450_s17 = scalar_select %p25_p2, %s1332_s14, %s27_s25  }
  0x2c   : > { %p36_p8 = por %p35_p4, %p34_p1  ;;  %p1583_p10 = scmp.eq.s32.totalorder %s1384_s16, 1 }
  0x2d   : > { %s148_s27 = sand.u32 1, %s1332_s14   ;;  %s883_s28 = sshll.u32 %s1336_s15, 9 }
  0x2e   : > { %p1454_p12 = por %p1583_p10, %p34_p1  ;;  %s871_s29 = sshll.u32 %s148_s27, 5 }
  0x2f   : > { %s1463_s4 = scalar_lea.hbm %s1572_s0, %s883_s28  ;;  %s152_s22 = scalar_lea.vmem [#allocation2], %s871_s29 }
  0x30   : > { %s160_s25 = sshll.u32 %s152_s22, 4  ;;  %p1465_p11 = pnand %p1170_p6, %p36_p8  ;;  %s1469_s25 = int_to_ptr.vmem [resolvable:$true] %s160_s25 }
  0x31   : > { %s149_s5 = scalar_lea.sflag [#allocation3], %s148_s27  ;;  %s1236_s6 = scalar_lea.hbm %s1463_s4, 512 }
  0x32   : > { %p1237_p13 = scmp.ne.s32.totalorder %s1463_s4, %s1236_s6  ;;  %p1238_p0 = pneg %p1465_p11 }
  0x33   : > { %s1241_s9 = scalar_lea.hbm %s1572_s0, 1024  ;;  %p1242_p7 = scmp.lt.u32.totalorder %s1463_s4, %s1572_s0 }
  0x34   : > { %p1239_p3 = pnand %p1238_p0, %p1237_p13  ;;  %p1243_p9 = scmp.lt.u32.totalorder %s1241_s9, %s1236_s6 }
  0x35   : > { %p1245_p1 = scmp.lt.u32.totalorder %s1236_s6, %s1463_s4 }
  0x36   : > { %p1240_p5 = pneg %p1239_p3  ;;  %p1244_p2 = por %p1243_p9, %p1242_p7 }
  0x38   : > { %p1246_p4 = por %p1245_p1, %p1244_p2 }
  0x3a   : > { %p1247_p6 = pnand %p1246_p4, %p1240_p5 }
  0x3c   : > { %1250 = shalt.err (!%p1247_p6)
}
  0x3d   : > { %s1251_s27 = scalar_lea.vmem %s1469_s25, 512  ;;  %s1341_s28 = smov [#allocation2]  }
  0x3e   : > { %p1252_p8 = scmp.ne.s32.totalorder %s1469_s25, %s1251_s27  ;;  %s1256_s29 = sshll.u32 %s1341_s28, 4  ;;  %s1257_s29 = int_to_ptr.vmem [resolvable:$false] %s1256_s29 }
  0x3f   : > { %s1258_s23 = scalar_lea.vmem %s1257_s29, 1024  ;;  %p1259_p3 = scmp.lt.s32.totalorder %s1469_s25, %s1257_s29 }
  0x40   : > { %p1254_p10 = pnand %p1252_p8, %p1238_p0  ;;  %p1260_p7 = scmp.lt.s32.totalorder %s1258_s23, %s1251_s27 }
  0x42   : > { %p1255_p13 = pneg %p1254_p10  ;;  %p1261_p9 = por %p1260_p7, %p1259_p3 }
  0x44   : > { %p1262_p2 = pnand %p1261_p9, %p1255_p13 }
  0x46   : > { %1265 = shalt.err (!%p1262_p2)
}
  0x47   : > { %1164 = dma.hbm_to_vmem [thread:$0]  (!%p1465_p11), %s1463_s4, 512, %s1469_s25, %s149_s5  }
  0x48   : > { %p1586_p5 = scmp.ne.s32.totalorder %s1581_s20, 0 }
  0x49   : > { %s1499_s30 = sand.u32 (!%p1586_p5), 1, %s1328_s13   ;;  %p1587_p0 = scmp.ne.s32.totalorder (!%p1586_p5), %s1579_s18, 0 }
  0x4a   : > { %169 = sbr.rel (%p1586_p5) target bundleno = 447 (0x1bf), region = 32  ;;  %s875_s22 = sshll.u32 (!%p1586_p5), %s1499_s30, 5 }
  0x4b   : > { %s172_s6 = scalar_lea.sflag (!%p1586_p5), [#allocation3], %s1499_s30  ;;  %s1505_s7 = scalar_lea.vmem (!%p1586_p5), [#allocation2], %s875_s22 }
  0x51   : > { %1311 = dma.done.wait (%p1587_p0), %s172_s6, 512  }
  0x52   : > { %1313 = vsyncadd (%p1587_p0), %s172_s6, 4294966784  ;;  %p1588_p11 = scmp.eq.s32.totalorder %s1384_s16, 0 }
  0x54   : > { %1315 = dma.done.wait (%p1588_p11), [#allocation6], 32768   ;;  %p1589_p1 = pmov %p1588_p11 }
  0x55   : > { %v207_v0 = vld [vmem:[#allocation5 + $0x8] sm:$0xff]  ;;  %v209_v2 = vld [vmem:[#allocation5 + $0x18] sm:$0xff]  ;;  %v206_v5 = vld [vmem:[#allocation5] sm:$0xff]  ;;  %s884_s4 = sshll.u32 %s1384_s16, 9  ;;  %s201_s25 = scalar_lea.vmem [#allocation7], %s875_s22 }
  0x56   : > { %1317 = vsyncadd (%p1589_p1), [#allocation6], 4294934528  ;;  %v211_v1 = vld [vmem:[#allocation5 + $0x28] sm:$0xff]  ;;  %v213_v4 = vld [vmem:[#allocation5 + $0x38] sm:$0xff]  ;;  %s787_s26 = sshll.u32 %s201_s25, 4  ;;  %s1528_s9 = scalar_lea.hbm %s1575_s3, %s884_s4  ;;  %s1530_s26 = int_to_ptr.vmem [resolvable:$true] %s787_s26 }
  0x57   : > { %v885_v3 = vpack.c.bf16 %v211_v1, %v207_v0  ;;  %v210_v6 = vld [vmem:[#allocation5 + $0x20] sm:$0xff]  ;;  %v1013_v7 = vpack.c.bf16 %v213_v4, %v209_v2  ;;  %v208_v9 = vld [vmem:[#allocation5 + $0x10] sm:$0xff]  ;;  %v215_v11 = vld [vmem:[#allocation5 + $0x48] sm:$0xff]  ;;  %s773_s16 = scalar_lea.sflag [#allocation4], %s1499_s30  ;;  %s1266_s10 = scalar_lea.vmem %s1530_s26, 512 }
  0x58   : > { %v887_v8 = vpack.c.bf16 %v210_v6, %v206_v5  ;;  %v212_v10 = vld [vmem:[#allocation5 + $0x30] sm:$0xff]  ;;  %v219_v13 = vld [vmem:[#allocation5 + $0x68] sm:$0xff]  ;;  %v217_v14 = vld [vmem:[#allocation5 + $0x58] sm:$0xff]  ;;  %p1267_p4 = scmp.ne.s32.totalorder %s1530_s26, %s1266_s10  ;;  %s1342_s11 = smov [#allocation7]  }
  0x59   : > { %886 = vmatprep.subr.bf16.mxu0 %v885_v3  ;;  %v1015_v12 = vpack.c.bf16 %v212_v10, %v208_v9  ;;  %v221_v15 = vld [vmem:[#allocation5 + $0x78] sm:$0xff]  ;;  %1014 = vmatprep.subr.bf16.mxu1 %v1013_v7  ;;  %v889_v16 = vpack.c.bf16 %v219_v13, %v215_v11  ;;  %v214_v18 = vld [vmem:[#allocation5 + $0x40] sm:$0xff]  ;;  %v216_v20 = vld [vmem:[#allocation5 + $0x50] sm:$0xff]  ;;  %s1270_s27 = sshll.u32 %s1342_s11, 4  ;;  %s1271_s27 = int_to_ptr.vmem [resolvable:$false] %s1270_s27 }
  0x5a   : > { %888 = vmatpush1.bf16.msra.mxu0 %v887_v8  ;;  %v1017_v17 = vpack.c.bf16 %v221_v15, %v217_v14  ;;  %v218_v19 = vld [vmem:[#allocation5 + $0x60] sm:$0xff]  ;;  %v220_v22 = vld [vmem:[#allocation5 + $0x70] sm:$0xff]  ;;  %v223_v23 = vld [vmem:[#allocation5 + $0x88] sm:$0xff]  ;;  %p1268_p6 = pnand %p1267_p4, %p1454_p12  ;;  %s1272_s28 = scalar_lea.vmem %s1271_s27, 1024 }
  0x5b   : > { %1016 = vmatpush1.bf16.msra.mxu1 %v1015_v12  ;;  %v891_v21 = vpack.c.bf16 %v218_v19, %v214_v18  ;;  %v227_v24 = vld [vmem:[#allocation5 + $0xa8] sm:$0xff]  ;;  %890 = vmatprep.subr.bf16.mxu0 %v889_v16  ;;  %v1019_v25 = vpack.c.bf16 %v220_v22, %v216_v20  ;;  %v225_v27 = vld [vmem:[#allocation5 + $0x98] sm:$0xff]  ;;  %v222_v29 = vld [vmem:[#allocation5 + $0x80] sm:$0xff]  ;;  %p1273_p10 = scmp.lt.s32.totalorder %s1530_s26, %s1271_s27  ;;  %p1274_p13 = scmp.lt.s32.totalorder %s1272_s28, %s1266_s10 }
  0x5c   : > { %1018 = vmatprep.subr.bf16.mxu1 %v1017_v17  ;;  %v893_v26 = vpack.c.bf16 %v227_v24, %v223_v23  ;;  %v229_v28 = vld [vmem:[#allocation5 + $0xb8] sm:$0xff]  ;;  %v226_v31 = vld [vmem:[#allocation5 + $0xa0] sm:$0xff]  ;;  %v224_v32 = vld [vmem:[#allocation5 + $0x90] sm:$0xff]  ;;  %p1269_p8 = pneg %p1268_p6 }
  0x5d   : > { %v1021_v30 = vpack.c.bf16 %v229_v28, %v225_v27  ;;  %v228_v33 = vld [vmem:[#allocation5 + $0xb0] sm:$0xff]  ;;  %v895_v34 = vpack.c.bf16 %v226_v31, %v222_v29  ;;  %v231_v35 = vld [vmem:[#allocation5 + $0xc8] sm:$0xff]  ;;  %v233_v37 = vld [vmem:[#allocation5 + $0xd8] sm:$0xff]  ;;  %p1275_p3 = por %p1274_p13, %p1273_p10 }
  0x5e   : > { %892 = vmatpush1.bf16.msra.mxu0 %v891_v21  ;;  %v235_v36 = vld [vmem:[#allocation5 + $0xe8] sm:$0xff]  ;;  %v1023_v38 = vpack.c.bf16 %v228_v33, %v224_v32  ;;  %v237_v40 = vld [vmem:[#allocation5 + $0xf8] sm:$0xff]  ;;  %v230_v41 = vld [vmem:[#allocation5 + $0xc0] sm:$0xff] }
  0x5f   : > { %1020 = vmatpush1.bf16.msra.mxu1 %v1019_v25  ;;  %894 = vmatprep.subr.bf16.mxu0 %v893_v26  ;;  %v897_v39 = vpack.c.bf16 %v235_v36, %v231_v35  ;;  %v234_v42 = vld [vmem:[#allocation5 + $0xe0] sm:$0xff]  ;;  %v1025_v43 = vpack.c.bf16 %v237_v40, %v233_v37  ;;  %v232_v44 = vld [vmem:[#allocation5 + $0xd0] sm:$0xff]  ;;  %v239_v46 = vld [vmem:[#allocation5 + $0x108] sm:$0xff]  ;;  %p1276_p7 = pnand %p1275_p3, %p1269_p8 }
  0x60   : > { %1022 = vmatprep.subr.bf16.mxu1 %v1021_v30  ;;  %v236_v45 = vld [vmem:[#allocation5 + $0xf0] sm:$0xff]  ;;  %v243_v47 = vld [vmem:[#allocation5 + $0x128] sm:$0xff]  ;;  %v241_v48 = vld [vmem:[#allocation5 + $0x118] sm:$0xff]  ;;  %v899_v50 = vpack.c.bf16 %v234_v42, %v230_v41 }
  0x61   : > { %v245_v49 = vld [vmem:[#allocation5 + $0x138] sm:$0xff]  ;;  %v1027_v51 = vpack.c.bf16 %v236_v45, %v232_v44  ;;  %v901_v52 = vpack.c.bf16 %v243_v47, %v239_v46  ;;  %v238_v53 = vld [vmem:[#allocation5 + $0x100] sm:$0xff]  ;;  %v240_v55 = vld [vmem:[#allocation5 + $0x110] sm:$0xff] }
  0x62   : > { %896 = vmatpush1.bf16.msra.mxu0 %v895_v34  ;;  %v242_v54 = vld [vmem:[#allocation5 + $0x120] sm:$0xff]  ;;  %v1029_v56 = vpack.c.bf16 %v245_v49, %v241_v48  ;;  %v244_v57 = vld [vmem:[#allocation5 + $0x130] sm:$0xff]  ;;  %v247_v58 = vld [vmem:[#allocation5 + $0x148] sm:$0xff] }
  0x63   : > { %1024 = vmatpush1.bf16.msra.mxu1 %v1023_v38  ;;  %898 = vmatprep.subr.bf16.mxu0 %v897_v39  ;;  %v251_v59 = vld [vmem:[#allocation5 + $0x168] sm:$0xff]  ;;  %v249_v60 = vld [vmem:[#allocation5 + $0x158] sm:$0xff]  ;;  %v903_v62 = vpack.c.bf16 %v242_v54, %v238_v53  ;;  %v1031_v63 = vpack.c.bf16 %v244_v57, %v240_v55  ;;  %v246_v1 = vld [vmem:[#allocation5 + $0x140] sm:$0xff] }
  0x64   : > { %1026 = vmatprep.subr.bf16.mxu1 %v1025_v43  ;;  %v253_v61 = vld [vmem:[#allocation5 + $0x178] sm:$0xff]  ;;  %v905_v0 = vpack.c.bf16 %v251_v59, %v247_v58  ;;  %v250_v2 = vld [vmem:[#allocation5 + $0x160] sm:$0xff]  ;;  %v248_v3 = vld [vmem:[#allocation5 + $0x150] sm:$0xff] }
  0x65   : > { %v1033_v4 = vpack.c.bf16 %v253_v61, %v249_v60  ;;  %v252_v5 = vld [vmem:[#allocation5 + $0x170] sm:$0xff]  ;;  %v255_v6 = vld [vmem:[#allocation5 + $0x188] sm:$0xff]  ;;  %v257_v8 = vld [vmem:[#allocation5 + $0x198] sm:$0xff]  ;;  %v907_v10 = vpack.c.bf16 %v250_v2, %v246_v1 }
  0x66   : > { %900 = vmatpush1.bf16.msra.mxu0 %v899_v50  ;;  %v259_v7 = vld [vmem:[#allocation5 + $0x1a8] sm:$0xff]  ;;  %v261_v9 = vld [vmem:[#allocation5 + $0x1b8] sm:$0xff]  ;;  %v1035_v11 = vpack.c.bf16 %v252_v5, %v248_v3  ;;  %v254_v13 = vld [vmem:[#allocation5 + $0x180] sm:$0xff] }
  0x67   : > { %1028 = vmatpush1.bf16.msra.mxu1 %v1027_v51  ;;  %902 = vmatprep.subr.bf16.mxu0 %v901_v52  ;;  %v909_v12 = vpack.c.bf16 %v259_v7, %v255_v6  ;;  %v258_v14 = vld [vmem:[#allocation5 + $0x1a0] sm:$0xff]  ;;  %v256_v15 = vld [vmem:[#allocation5 + $0x190] sm:$0xff]  ;;  %v1037_v16 = vpack.c.bf16 %v261_v9, %v257_v8  ;;  %v263_v18 = vld [vmem:[#allocation5 + $0x1c8] sm:$0xff] }
  0x68   : > { %1030 = vmatprep.subr.bf16.mxu1 %v1029_v56  ;;  %v260_v17 = vld [vmem:[#allocation5 + $0x1b0] sm:$0xff]  ;;  %v267_v19 = vld [vmem:[#allocation5 + $0x1e8] sm:$0xff]  ;;  %v265_v20 = vld [vmem:[#allocation5 + $0x1d8] sm:$0xff]  ;;  %v911_v22 = vpack.c.bf16 %v258_v14, %v254_v13 }
  0x69   : > { %v269_v21 = vld [vmem:[#allocation5 + $0x1f8] sm:$0xff]  ;;  %v1039_v23 = vpack.c.bf16 %v260_v17, %v256_v15  ;;  %v913_v24 = vpack.c.bf16 %v267_v19, %v263_v18  ;;  %v262_v25 = vld [vmem:[#allocation5 + $0x1c0] sm:$0xff]  ;;  %v264_v27 = vld [vmem:[#allocation5 + $0x1d0] sm:$0xff] }
  0x6a   : > { %904 = vmatpush1.bf16.msra.mxu0 %v903_v62  ;;  %v266_v26 = vld [vmem:[#allocation5 + $0x1e0] sm:$0xff]  ;;  %v1041_v28 = vpack.c.bf16 %v269_v21, %v265_v20  ;;  %v268_v29 = vld [vmem:[#allocation5 + $0x1f0] sm:$0xff]  ;;  %v271_v30 = vld [vmem:[#allocation5 + $0x208] sm:$0xff] }
  0x6b   : > { %1032 = vmatpush1.bf16.msra.mxu1 %v1031_v63  ;;  %906 = vmatprep.subr.bf16.mxu0 %v905_v0  ;;  %v275_v31 = vld [vmem:[#allocation5 + $0x228] sm:$0xff]  ;;  %v273_v32 = vld [vmem:[#allocation5 + $0x218] sm:$0xff]  ;;  %v915_v34 = vpack.c.bf16 %v266_v26, %v262_v25  ;;  %v1043_v35 = vpack.c.bf16 %v268_v29, %v264_v27  ;;  %v270_v37 = vld [vmem:[#allocation5 + $0x200] sm:$0xff] }
  0x6c   : > { %1034 = vmatprep.subr.bf16.mxu1 %v1033_v4  ;;  %v277_v33 = vld [vmem:[#allocation5 + $0x238] sm:$0xff]  ;;  %v917_v36 = vpack.c.bf16 %v275_v31, %v271_v30  ;;  %v274_v38 = vld [vmem:[#allocation5 + $0x220] sm:$0xff]  ;;  %v272_v39 = vld [vmem:[#allocation5 + $0x210] sm:$0xff] }
  0x6d   : > { %v1045_v40 = vpack.c.bf16 %v277_v33, %v273_v32  ;;  %v276_v41 = vld [vmem:[#allocation5 + $0x230] sm:$0xff]  ;;  %v279_v42 = vld [vmem:[#allocation5 + $0x248] sm:$0xff]  ;;  %v281_v44 = vld [vmem:[#allocation5 + $0x258] sm:$0xff]  ;;  %v919_v46 = vpack.c.bf16 %v274_v38, %v270_v37 }
  0x6e   : > { %908 = vmatpush1.bf16.msra.mxu0 %v907_v10  ;;  %v283_v43 = vld [vmem:[#allocation5 + $0x268] sm:$0xff]  ;;  %v285_v45 = vld [vmem:[#allocation5 + $0x278] sm:$0xff]  ;;  %v1047_v47 = vpack.c.bf16 %v276_v41, %v272_v39  ;;  %v278_v49 = vld [vmem:[#allocation5 + $0x240] sm:$0xff] }
  0x6f   : > { %1036 = vmatpush1.bf16.msra.mxu1 %v1035_v11  ;;  %910 = vmatprep.subr.bf16.mxu0 %v909_v12  ;;  %v921_v48 = vpack.c.bf16 %v283_v43, %v279_v42  ;;  %v282_v50 = vld [vmem:[#allocation5 + $0x260] sm:$0xff]  ;;  %v280_v51 = vld [vmem:[#allocation5 + $0x250] sm:$0xff]  ;;  %v1049_v52 = vpack.c.bf16 %v285_v45, %v281_v44  ;;  %v287_v54 = vld [vmem:[#allocation5 + $0x288] sm:$0xff] }
  0x70   : > { %1038 = vmatprep.subr.bf16.mxu1 %v1037_v16  ;;  %v284_v53 = vld [vmem:[#allocation5 + $0x270] sm:$0xff]  ;;  %v291_v55 = vld [vmem:[#allocation5 + $0x2a8] sm:$0xff]  ;;  %v289_v56 = vld [vmem:[#allocation5 + $0x298] sm:$0xff]  ;;  %v923_v58 = vpack.c.bf16 %v282_v50, %v278_v49 }
  0x71   : > { %v293_v57 = vld [vmem:[#allocation5 + $0x2b8] sm:$0xff]  ;;  %v1051_v59 = vpack.c.bf16 %v284_v53, %v280_v51  ;;  %v925_v60 = vpack.c.bf16 %v291_v55, %v287_v54  ;;  %v286_v61 = vld [vmem:[#allocation5 + $0x280] sm:$0xff]  ;;  %v288_v63 = vld [vmem:[#allocation5 + $0x290] sm:$0xff] }
  0x72   : > { %912 = vmatpush1.bf16.msra.mxu0 %v911_v22  ;;  %v290_v62 = vld [vmem:[#allocation5 + $0x2a0] sm:$0xff]  ;;  %v1053_v0 = vpack.c.bf16 %v293_v57, %v289_v56  ;;  %v292_v1 = vld [vmem:[#allocation5 + $0x2b0] sm:$0xff]  ;;  %v295_v2 = vld [vmem:[#allocation5 + $0x2c8] sm:$0xff] }
  0x73   : > { %1040 = vmatpush1.bf16.msra.mxu1 %v1039_v23  ;;  %914 = vmatprep.subr.bf16.mxu0 %v913_v24  ;;  %v299_v3 = vld [vmem:[#allocation5 + $0x2e8] sm:$0xff]  ;;  %v297_v4 = vld [vmem:[#allocation5 + $0x2d8] sm:$0xff]  ;;  %v927_v6 = vpack.c.bf16 %v290_v62, %v286_v61  ;;  %v294_v7 = vld [vmem:[#allocation5 + $0x2c0] sm:$0xff]  ;;  %v1055_v8 = vpack.c.bf16 %v292_v1, %v288_v63 }
  0x74   : > { %1042 = vmatprep.subr.bf16.mxu1 %v1041_v28  ;;  %v301_v5 = vld [vmem:[#allocation5 + $0x2f8] sm:$0xff]  ;;  %v929_v9 = vpack.c.bf16 %v299_v3, %v295_v2  ;;  %v298_v10 = vld [vmem:[#allocation5 + $0x2e0] sm:$0xff]  ;;  %v296_v11 = vld [vmem:[#allocation5 + $0x2d0] sm:$0xff] }
  0x75   : > { %v300_v12 = vld [vmem:[#allocation5 + $0x2f0] sm:$0xff]  ;;  %v1057_v13 = vpack.c.bf16 %v301_v5, %v297_v4  ;;  %v303_v14 = vld [vmem:[#allocation5 + $0x308] sm:$0xff]  ;;  %v305_v17 = vld [vmem:[#allocation5 + $0x318] sm:$0xff]  ;;  %v931_v19 = vpack.c.bf16 %v298_v10, %v294_v7 }
  0x76   : > { %916 = vmatpush1.bf16.msra.mxu0 %v915_v34  ;;  %v307_v15 = vld [vmem:[#allocation5 + $0x328] sm:$0xff]  ;;  %v309_v18 = vld [vmem:[#allocation5 + $0x338] sm:$0xff]  ;;  %v1059_v20 = vpack.c.bf16 %v300_v12, %v296_v11  ;;  %v302_v22 = vld [vmem:[#allocation5 + $0x300] sm:$0xff] }
  0x77   : > { %1044 = vmatpush1.bf16.msra.mxu1 %v1043_v35  ;;  %918 = vmatprep.subr.bf16.mxu0 %v917_v36  ;;  %v203_v16 = vld [vmem:[%s1505_s7 + $0x8] sm:$0xff]  ;;  %v933_v21 = vpack.c.bf16 %v307_v15, %v303_v14  ;;  %v306_v23 = vld [vmem:[#allocation5 + $0x320] sm:$0xff]  ;;  %v304_v24 = vld [vmem:[#allocation5 + $0x310] sm:$0xff]  ;;  %v1061_v25 = vpack.c.bf16 %v309_v18, %v305_v17 }
  0x78   : > { %1046 = vmatprep.subr.bf16.mxu1 %v1045_v40  ;;  %548 = vmatprep.mubr.f32.mxu0 %v203_v16  ;;  %v308_v26 = vld [vmem:[#allocation5 + $0x330] sm:$0xff]  ;;  %v311_v27 = vld [vmem:[#allocation5 + $0x348] sm:$0xff]  ;;  %v313_v29 = vld [vmem:[#allocation5 + $0x358] sm:$0xff]  ;;  %v935_v31 = vpack.c.bf16 %v306_v23, %v302_v22 }
  0x79   : > { %690 = vmatprep.mubr.f32.mxu1 %v203_v16  ;;  %v315_v28 = vld [vmem:[#allocation5 + $0x368] sm:$0xff]  ;;  %v317_v30 = vld [vmem:[#allocation5 + $0x378] sm:$0xff]  ;;  %v1063_v32 = vpack.c.bf16 %v308_v26, %v304_v24  ;;  %v310_v34 = vld [vmem:[#allocation5 + $0x340] sm:$0xff] }
  0x7a   : > { %920 = vmatpush1.bf16.msra.mxu0 %v919_v46  ;;  %v937_v33 = vpack.c.bf16 %v315_v28, %v311_v27  ;;  %v314_v35 = vld [vmem:[#allocation5 + $0x360] sm:$0xff]  ;;  %v312_v36 = vld [vmem:[#allocation5 + $0x350] sm:$0xff]  ;;  %v1065_v37 = vpack.c.bf16 %v317_v30, %v313_v29  ;;  %v319_v39 = vld [vmem:[#allocation5 + $0x388] sm:$0xff] }
  0x7b   : > { %1048 = vmatpush1.bf16.msra.mxu1 %v1047_v47  ;;  %922 = vmatprep.subr.bf16.mxu0 %v921_v48  ;;  %v316_v38 = vld [vmem:[#allocation5 + $0x370] sm:$0xff]  ;;  %v323_v40 = vld [vmem:[#allocation5 + $0x3a8] sm:$0xff]  ;;  %v321_v41 = vld [vmem:[#allocation5 + $0x398] sm:$0xff]  ;;  %v939_v43 = vpack.c.bf16 %v314_v35, %v310_v34 }
  0x7c   : > { %1050 = vmatprep.subr.bf16.mxu1 %v1049_v52  ;;  %v325_v42 = vld [vmem:[#allocation5 + $0x3b8] sm:$0xff]  ;;  %v1067_v44 = vpack.c.bf16 %v316_v38, %v312_v36  ;;  %v941_v45 = vpack.c.bf16 %v323_v40, %v319_v39  ;;  %v318_v46 = vld [vmem:[#allocation5 + $0x380] sm:$0xff]  ;;  %v320_v48 = vld [vmem:[#allocation5 + $0x390] sm:$0xff] }
  0x7d   : > { %v322_v47 = vld [vmem:[#allocation5 + $0x3a0] sm:$0xff]  ;;  %v1069_v49 = vpack.c.bf16 %v325_v42, %v321_v41  ;;  %v324_v50 = vld [vmem:[#allocation5 + $0x3b0] sm:$0xff]  ;;  %v327_v51 = vld [vmem:[#allocation5 + $0x3c8] sm:$0xff] }
  0x7e   : > { %924 = vmatpush1.bf16.msra.mxu0 %v923_v58  ;;  %v331_v52 = vld [vmem:[#allocation5 + $0x3e8] sm:$0xff]  ;;  %v329_v53 = vld [vmem:[#allocation5 + $0x3d8] sm:$0xff]  ;;  %v943_v55 = vpack.c.bf16 %v322_v47, %v318_v46  ;;  %v1071_v56 = vpack.c.bf16 %v324_v50, %v320_v48  ;;  %v326_v58 = vld [vmem:[#allocation5 + $0x3c0] sm:$0xff] }
  0x7f   : > { %1052 = vmatpush1.bf16.msra.mxu1 %v1051_v59  ;;  %926 = vmatprep.subr.bf16.mxu0 %v925_v60  ;;  %v333_v54 = vld [vmem:[#allocation5 + $0x3f8] sm:$0xff]  ;;  %v945_v57 = vpack.c.bf16 %v331_v52, %v327_v51  ;;  %v330_v59 = vld [vmem:[#allocation5 + $0x3e0] sm:$0xff]  ;;  %v328_v60 = vld [vmem:[#allocation5 + $0x3d0] sm:$0xff] }
  0x80   : > { %1054 = vmatprep.subr.bf16.mxu1 %v1053_v0  ;;  %v1073_v61 = vpack.c.bf16 %v333_v54, %v329_v53  ;;  %v332_v62 = vld [vmem:[#allocation5 + $0x3f0] sm:$0xff]  ;;  %v335_v63 = vld [vmem:[#allocation5 + $0x408] sm:$0xff]  ;;  %v337_v1 = vld [vmem:[#allocation5 + $0x418] sm:$0xff]  ;;  %v947_v3 = vpack.c.bf16 %v330_v59, %v326_v58 }
  0x81   : > { %v339_v0 = vld [vmem:[#allocation5 + $0x428] sm:$0xff]  ;;  %v341_v2 = vld [vmem:[#allocation5 + $0x438] sm:$0xff]  ;;  %v1075_v4 = vpack.c.bf16 %v332_v62, %v328_v60  ;;  %v338_v7 = vld [vmem:[#allocation5 + $0x420] sm:$0xff] }
  0x82   : > { %928 = vmatpush1.bf16.msra.mxu0 %v927_v6  ;;  %v949_v5 = vpack.c.bf16 %v339_v0, %v335_v63  ;;  %v334_v6 = vld [vmem:[#allocation5 + $0x400] sm:$0xff]  ;;  %v340_v10 = vld [vmem:[#allocation5 + $0x430] sm:$0xff]  ;;  %v343_v11 = vld [vmem:[#allocation5 + $0x448] sm:$0xff] }
  0x83   : > { %1056 = vmatpush1.bf16.msra.mxu1 %v1055_v8  ;;  %930 = vmatprep.subr.bf16.mxu0 %v929_v9  ;;  %v336_v8 = vld [vmem:[#allocation5 + $0x410] sm:$0xff]  ;;  %v1077_v9 = vpack.c.bf16 %v341_v2, %v337_v1  ;;  %v347_v12 = vld [vmem:[#allocation5 + $0x468] sm:$0xff]  ;;  %v349_v14 = vld [vmem:[#allocation5 + $0x478] sm:$0xff]  ;;  %v951_v16 = vpack.c.bf16 %v338_v7, %v334_v6 }
  0x84   : > { %1058 = vmatprep.subr.bf16.mxu1 %v1057_v13  ;;  %v345_v13 = vld [vmem:[#allocation5 + $0x458] sm:$0xff]  ;;  %v202_v15 = vld [vmem:[%s1505_s7] sm:$0xff]  ;;  %v1079_v17 = vpack.c.bf16 %v340_v10, %v336_v8  ;;  %v953_v18 = vpack.c.bf16 %v347_v12, %v343_v11  ;;  %v348_v23 = vld [vmem:[#allocation5 + $0x470] sm:$0xff] }
  0x85   : > { %v1081_v22 = vpack.c.bf16 %v349_v14, %v345_v13  ;;  %v351_v24 = vld [vmem:[#allocation5 + $0x488] sm:$0xff]  ;;  %v353_v26 = vld [vmem:[#allocation5 + $0x498] sm:$0xff]  ;;  %v356_v35 = vld [vmem:[#allocation5 + $0x4b0] sm:$0xff] }
  0x86   : > { %932 = vmatpush1.bf16.msra.mxu0 %v931_v19  ;;  %v342_v19 = vld [vmem:[#allocation5 + $0x440] sm:$0xff]  ;;  %v357_v27 = vld [vmem:[#allocation5 + $0x4b8] sm:$0xff]  ;;  %v359_v36 = vld [vmem:[#allocation5 + $0x4c8] sm:$0xff] }
  0x87   : > { %1060 = vmatpush1.bf16.msra.mxu1 %v1059_v20  ;;  %934 = vmatprep.subr.bf16.mxu0 %v933_v21  ;;  %v346_v20 = vld [vmem:[#allocation5 + $0x460] sm:$0xff]  ;;  %v344_v21 = vld [vmem:[#allocation5 + $0x450] sm:$0xff]  ;;  %v1085_v34 = vpack.c.bf16 %v357_v27, %v353_v26  ;;  %v361_v38 = vld [vmem:[#allocation5 + $0x4d8] sm:$0xff] }
  0x88   : > { %1062 = vmatprep.subr.bf16.mxu1 %v1061_v25  ;;  %v355_v25 = vld [vmem:[#allocation5 + $0x4a8] sm:$0xff]  ;;  %v955_v28 = vpack.c.bf16 %v346_v20, %v342_v19  ;;  %v1083_v29 = vpack.c.bf16 %v348_v23, %v344_v21  ;;  %v365_v39 = vld [vmem:[#allocation5 + $0x4f8] sm:$0xff]  ;;  %v364_v47 = vld [vmem:[#allocation5 + $0x4f0] sm:$0xff] }
  0x89   : > { %v957_v30 = vpack.c.bf16 %v355_v25, %v351_v24  ;;  %v1089_v46 = vpack.c.bf16 %v365_v39, %v361_v38  ;;  %v367_v48 = vld [vmem:[#allocation5 + $0x508] sm:$0xff]  ;;  %v369_v50 = vld [vmem:[#allocation5 + $0x518] sm:$0xff]  ;;  %v372_v59 = vld [vmem:[#allocation5 + $0x530] sm:$0xff] }
  0x8a   : > { %936 = vmatpush1.bf16.msra.mxu0 %v935_v31  ;;  %v350_v31 = vld [vmem:[#allocation5 + $0x480] sm:$0xff]  ;;  %v373_v51 = vld [vmem:[#allocation5 + $0x538] sm:$0xff]  ;;  %v375_v60 = vld [vmem:[#allocation5 + $0x548] sm:$0xff] }
  0x8b   : > { %1064 = vmatpush1.bf16.msra.mxu1 %v1063_v32  ;;  %938 = vmatprep.subr.bf16.mxu0 %v937_v33  ;;  %v354_v32 = vld [vmem:[#allocation5 + $0x4a0] sm:$0xff]  ;;  %v352_v33 = vld [vmem:[#allocation5 + $0x490] sm:$0xff]  ;;  %v1093_v58 = vpack.c.bf16 %v373_v51, %v369_v50  ;;  %v377_v62 = vld [vmem:[#allocation5 + $0x558] sm:$0xff] }
  0x8c   : > { %1066 = vmatprep.subr.bf16.mxu1 %v1065_v37  ;;  %v363_v37 = vld [vmem:[#allocation5 + $0x4e8] sm:$0xff]  ;;  %v959_v40 = vpack.c.bf16 %v354_v32, %v350_v31  ;;  %v1087_v41 = vpack.c.bf16 %v356_v35, %v352_v33  ;;  %v381_v63 = vld [vmem:[#allocation5 + $0x578] sm:$0xff]  ;;  %v380_v7 = vld [vmem:[#allocation5 + $0x570] sm:$0xff] }
  0x8d   : > { %v961_v42 = vpack.c.bf16 %v363_v37, %v359_v36  ;;  %v1097_v6 = vpack.c.bf16 %v381_v63, %v377_v62  ;;  %v383_v8 = vld [vmem:[#allocation5 + $0x588] sm:$0xff]  ;;  %v385_v10 = vld [vmem:[#allocation5 + $0x598] sm:$0xff]  ;;  %v382_v13 = vld [vmem:[#allocation5 + $0x580] sm:$0xff] }
  0x8e   : > { %940 = vmatpush1.bf16.msra.mxu0 %v939_v43  ;;  %v358_v43 = vld [vmem:[#allocation5 + $0x4c0] sm:$0xff]  ;;  %v389_v11 = vld [vmem:[#allocation5 + $0x5b8] sm:$0xff]  ;;  %v391_v20 = vld [vmem:[#allocation5 + $0x5c8] sm:$0xff] }
  0x8f   : > { %1068 = vmatpush1.bf16.msra.mxu1 %v1067_v44  ;;  %942 = vmatprep.subr.bf16.mxu0 %v941_v45  ;;  %v362_v44 = vld [vmem:[#allocation5 + $0x4e0] sm:$0xff]  ;;  %v360_v45 = vld [vmem:[#allocation5 + $0x4d0] sm:$0xff]  ;;  %v1101_v19 = vpack.c.bf16 %v389_v11, %v385_v10  ;;  %v395_v21 = vld [vmem:[#allocation5 + $0x5e8] sm:$0xff] }
  0x90   : > { %1070 = vmatprep.subr.bf16.mxu1 %v1069_v49  ;;  %v371_v49 = vld [vmem:[#allocation5 + $0x528] sm:$0xff]  ;;  %v963_v52 = vpack.c.bf16 %v362_v44, %v358_v43  ;;  %v1091_v53 = vpack.c.bf16 %v364_v47, %v360_v45  ;;  %v393_v23 = vld [vmem:[#allocation5 + $0x5d8] sm:$0xff]  ;;  %v977_v27 = vpack.c.bf16 %v395_v21, %v391_v20  ;;  %v396_v32 = vld [vmem:[#allocation5 + $0x5f0] sm:$0xff] }
  0x91   : > { %v965_v54 = vpack.c.bf16 %v371_v49, %v367_v48  ;;  %v397_v24 = vld [vmem:[#allocation5 + $0x5f8] sm:$0xff]  ;;  %v399_v33 = vld [vmem:[#allocation5 + $0x608] sm:$0xff]  ;;  %v404_v44 = vld [vmem:[#allocation5 + $0x630] sm:$0xff] }
  0x92   : > { %944 = vmatpush1.bf16.msra.mxu0 %v943_v55  ;;  %v366_v55 = vld [vmem:[#allocation5 + $0x500] sm:$0xff]  ;;  %v1105_v31 = vpack.c.bf16 %v397_v24, %v393_v23  ;;  %v401_v35 = vld [vmem:[#allocation5 + $0x618] sm:$0xff]  ;;  %v407_v45 = vld [vmem:[#allocation5 + $0x648] sm:$0xff] }
  0x93   : > { %1072 = vmatpush1.bf16.msra.mxu1 %v1071_v56  ;;  %946 = vmatprep.subr.bf16.mxu0 %v945_v57  ;;  %v370_v56 = vld [vmem:[#allocation5 + $0x520] sm:$0xff]  ;;  %v368_v57 = vld [vmem:[#allocation5 + $0x510] sm:$0xff]  ;;  %v405_v36 = vld [vmem:[#allocation5 + $0x638] sm:$0xff] }
  0x94   : > { %1074 = vmatprep.subr.bf16.mxu1 %v1073_v61  ;;  %v379_v61 = vld [vmem:[#allocation5 + $0x568] sm:$0xff]  ;;  %v967_v0 = vpack.c.bf16 %v370_v56, %v366_v55  ;;  %v1095_v1 = vpack.c.bf16 %v372_v59, %v368_v57  ;;  %v1109_v43 = vpack.c.bf16 %v405_v36, %v401_v35  ;;  %v409_v47 = vld [vmem:[#allocation5 + $0x658] sm:$0xff]  ;;  %v412_v56 = vld [vmem:[#allocation5 + $0x670] sm:$0xff] }
  0x95   : > { %v969_v2 = vpack.c.bf16 %v379_v61, %v375_v60  ;;  %v413_v48 = vld [vmem:[#allocation5 + $0x678] sm:$0xff]  ;;  %v415_v57 = vld [vmem:[#allocation5 + $0x688] sm:$0xff]  ;;  %v430_v24 = vld [vmem:[#allocation5 + $0x700] sm:$0xff] }
  0x96   : > { %948 = vmatpush1.bf16.msra.mxu0 %v947_v3  ;;  %v374_v3 = vld [vmem:[#allocation5 + $0x540] sm:$0xff]  ;;  %v1113_v55 = vpack.c.bf16 %v413_v48, %v409_v47  ;;  %v417_v59 = vld [vmem:[#allocation5 + $0x698] sm:$0xff] }
  0x97   : > { %1076 = vmatpush1.bf16.msra.mxu1 %v1075_v4  ;;  %950 = vmatprep.subr.bf16.mxu0 %v949_v5  ;;  %v378_v4 = vld [vmem:[#allocation5 + $0x560] sm:$0xff]  ;;  %v376_v5 = vld [vmem:[#allocation5 + $0x550] sm:$0xff]  ;;  %v421_v60 = vld [vmem:[#allocation5 + $0x6b8] sm:$0xff] }
  0x98   : > { %1078 = vmatprep.subr.bf16.mxu1 %v1077_v9  ;;  %v387_v9 = vld [vmem:[#allocation5 + $0x5a8] sm:$0xff]  ;;  %v971_v12 = vpack.c.bf16 %v378_v4, %v374_v3  ;;  %v1099_v14 = vpack.c.bf16 %v380_v7, %v376_v5  ;;  %v1117_v3 = vpack.c.bf16 %v421_v60, %v417_v59  ;;  %v420_v4 = vld [vmem:[#allocation5 + $0x6b0] sm:$0xff]  ;;  %v425_v7 = vld [vmem:[#allocation5 + $0x6d8] sm:$0xff] }
  0x99   : > { %549 = vmatmul.mubr.f32.vlgmr.msra.gmra.mrb[0].mxu0 %v202_v15  ;;  %v423_v5 = vld [vmem:[#allocation5 + $0x6c8] sm:$0xff]  ;;  %v437_v20 = vld [vmem:[#allocation5 + $0x738] sm:$0xff]  ;;  %v438_v36 = vld [vmem:[#allocation5 + $0x740] sm:$0xff] }
  0x9a   : > { %952 = vmatpush1.bf16.msra.mxu0 %v951_v16  ;;  %691 = vmatmul.mubr.f32.vlgmr.msra.gmra.mrb[0].mxu1 %v202_v15  ;;  %v973_v15 = vpack.c.bf16 %v387_v9, %v383_v8  ;;  %v386_v16 = vld [vmem:[#allocation5 + $0x5a0] sm:$0xff]  ;;  %v429_v8 = vld [vmem:[#allocation5 + $0x6f8] sm:$0xff] }
  0x9b   : > { %1080 = vmatpush1.bf16.msra.mxu1 %v1079_v17  ;;  %954 = vmatprep.subr.bf16.mxu0 %v953_v18  ;;  %v384_v17 = vld [vmem:[#allocation5 + $0x590] sm:$0xff]  ;;  %v975_v25 = vpack.c.bf16 %v386_v16, %v382_v13  ;;  %v426_v13 = vld [vmem:[#allocation5 + $0x6e0] sm:$0xff] }
  0x9c   : > { %1082 = vmatprep.subr.bf16.mxu1 %v1081_v22  ;;  %v388_v18 = vld [vmem:[#allocation5 + $0x5b0] sm:$0xff]  ;;  %v205_v22 = vld [vmem:[%s1505_s7 + $0x18] sm:$0xff]  ;;  %v446_v48 = vld [vmem:[#allocation5 + $0x780] sm:$0xff] }
  0x9d   : > { %619 = vmatprep.mubr.f32.mxu0 %v205_v22  ;;  %761 = vmatprep.mubr.f32.mxu1 %v205_v22  ;;  %v1103_v26 = vpack.c.bf16 %v388_v18, %v384_v17  ;;  %v428_v16 = vld [vmem:[#allocation5 + $0x6f0] sm:$0xff]  ;;  %v431_v17 = vld [vmem:[#allocation5 + $0x708] sm:$0xff]  ;;  %v454_v60 = vld [vmem:[#allocation5 + $0x7c0] sm:$0xff] }
  0x9e   : > { %956 = vmatpush1.bf16.msra.mxu0 %v955_v28  ;;  %v390_v28 = vld [vmem:[#allocation5 + $0x5c0] sm:$0xff]  ;;  %v435_v18 = vld [vmem:[#allocation5 + $0x728] sm:$0xff] }
  0x9f   : > { %1084 = vmatpush1.bf16.msra.mxu1 %v1083_v29  ;;  %958 = vmatprep.subr.bf16.mxu0 %v957_v30  ;;  %v394_v29 = vld [vmem:[#allocation5 + $0x5e0] sm:$0xff]  ;;  %v392_v30 = vld [vmem:[#allocation5 + $0x5d0] sm:$0xff]  ;;  %v997_v23 = vpack.c.bf16 %v435_v18, %v431_v17 }
  0xa0   : > { %1086 = vmatprep.subr.bf16.mxu1 %v1085_v34  ;;  %v403_v34 = vld [vmem:[#allocation5 + $0x628] sm:$0xff]  ;;  %v979_v37 = vpack.c.bf16 %v394_v29, %v390_v28  ;;  %v1107_v38 = vpack.c.bf16 %v396_v32, %v392_v30  ;;  %v436_v28 = vld [vmem:[#allocation5 + $0x730] sm:$0xff]  ;;  %v445_v32 = vld [vmem:[#allocation5 + $0x778] sm:$0xff] }
  0xa1   : > { %v981_v39 = vpack.c.bf16 %v403_v34, %v399_v33  ;;  %v439_v29 = vld [vmem:[#allocation5 + $0x748] sm:$0xff] }
  0xa2   : > { %960 = vmatpush1.bf16.msra.mxu0 %v959_v40  ;;  %v398_v40 = vld [vmem:[#allocation5 + $0x600] sm:$0xff]  ;;  %v443_v30 = vld [vmem:[#allocation5 + $0x768] sm:$0xff] }
  0xa3   : > { %1088 = vmatpush1.bf16.msra.mxu1 %v1087_v41  ;;  %962 = vmatprep.subr.bf16.mxu0 %v961_v42  ;;  %v402_v41 = vld [vmem:[#allocation5 + $0x620] sm:$0xff]  ;;  %v400_v42 = vld [vmem:[#allocation5 + $0x610] sm:$0xff]  ;;  %v1001_v35 = vpack.c.bf16 %v443_v30, %v439_v29 }
  0xa4   : > { %1090 = vmatprep.subr.bf16.mxu1 %v1089_v46  ;;  %v411_v46 = vld [vmem:[#allocation5 + $0x668] sm:$0xff]  ;;  %v983_v49 = vpack.c.bf16 %v402_v41, %v398_v40  ;;  %v1111_v50 = vpack.c.bf16 %v404_v44, %v400_v42  ;;  %v444_v40 = vld [vmem:[#allocation5 + $0x770] sm:$0xff]  ;;  %v453_v44 = vld [vmem:[#allocation5 + $0x7b8] sm:$0xff] }
  0xa5   : > { %v985_v51 = vpack.c.bf16 %v411_v46, %v407_v45  ;;  %v447_v41 = vld [vmem:[#allocation5 + $0x788] sm:$0xff] }
  0xa6   : > { %964 = vmatpush1.bf16.msra.mxu0 %v963_v52  ;;  %v406_v52 = vld [vmem:[#allocation5 + $0x640] sm:$0xff]  ;;  %v451_v42 = vld [vmem:[#allocation5 + $0x7a8] sm:$0xff] }
  0xa7   : > { %1092 = vmatpush1.bf16.msra.mxu1 %v1091_v53  ;;  %966 = vmatprep.subr.bf16.mxu0 %v965_v54  ;;  %v410_v53 = vld [vmem:[#allocation5 + $0x660] sm:$0xff]  ;;  %v408_v54 = vld [vmem:[#allocation5 + $0x650] sm:$0xff]  ;;  %v1005_v47 = vpack.c.bf16 %v451_v42, %v447_v41 }
  0xa8   : > { %1094 = vmatprep.subr.bf16.mxu1 %v1093_v58  ;;  %v419_v58 = vld [vmem:[#allocation5 + $0x6a8] sm:$0xff]  ;;  %v987_v61 = vpack.c.bf16 %v410_v53, %v406_v52  ;;  %v1115_v62 = vpack.c.bf16 %v412_v56, %v408_v54  ;;  %v452_v52 = vld [vmem:[#allocation5 + $0x7b0] sm:$0xff]  ;;  %v461_v56 = vld [vmem:[#allocation5 + $0x7f8] sm:$0xff] }
  0xa9   : > { %v989_v63 = vpack.c.bf16 %v419_v58, %v415_v57  ;;  %v455_v53 = vld [vmem:[#allocation5 + $0x7c8] sm:$0xff] }
  0xaa   : > { %968 = vmatpush1.bf16.msra.mxu0 %v967_v0  ;;  %v414_v0 = vld [vmem:[#allocation5 + $0x680] sm:$0xff]  ;;  %v459_v54 = vld [vmem:[#allocation5 + $0x7e8] sm:$0xff] }
  0xab   : > { %1096 = vmatpush1.bf16.msra.mxu1 %v1095_v1  ;;  %970 = vmatprep.subr.bf16.mxu0 %v969_v2  ;;  %v418_v1 = vld [vmem:[#allocation5 + $0x6a0] sm:$0xff]  ;;  %v416_v2 = vld [vmem:[#allocation5 + $0x690] sm:$0xff]  ;;  %v1009_v59 = vpack.c.bf16 %v459_v54, %v455_v53 }
  0xac   : > { %1098 = vmatprep.subr.bf16.mxu1 %v1097_v6  ;;  %v427_v6 = vld [vmem:[#allocation5 + $0x6e8] sm:$0xff]  ;;  %v991_v9 = vpack.c.bf16 %v418_v1, %v414_v0  ;;  %v1119_v10 = vpack.c.bf16 %v420_v4, %v416_v2  ;;  %v460_v0 = vld [vmem:[#allocation5 + $0x7f0] sm:$0xff]  ;;  %v464_v4 = vlaneseq }
  0xad   : > { %v993_v11 = vpack.c.bf16 %v427_v6, %v423_v5 }
  0xae   : > { %972 = vmatpush1.bf16.msra.mxu0 %v971_v12  ;;  %v422_v12 = vld [vmem:[#allocation5 + $0x6c0] sm:$0xff]  ;;  %v465_v5 = vshrl.u32 %v464_v4, 7 }
  0xaf   : > { %1100 = vmatpush1.bf16.msra.mxu1 %v1099_v14  ;;  %974 = vmatprep.subr.bf16.mxu0 %v973_v15  ;;  %v424_v14 = vld [vmem:[#allocation5 + $0x6d0] sm:$0xff]  ;;  %v1121_v15 = vpack.c.bf16 %v429_v8, %v425_v7  ;;  %v995_v21 = vpack.c.bf16 %v426_v13, %v422_v12  ;;  %v462_v7 = vld [vmem:[%s1574_s2] sm:$0xf] }
  0xb0   : > { %1102 = vmatprep.subr.bf16.mxu1 %v1101_v19  ;;  %v433_v19 = vld [vmem:[#allocation5 + $0x718] sm:$0xff]  ;;  %v1123_v22 = vpack.c.bf16 %v428_v16, %v424_v14  ;;  %v466_v6 = vsub.s32 0, %v465_v5  ;;  %v474_v8 = vsub.s32 2, %v465_v5 }
  0xb2   : > { %976 = vmatpush1.bf16.msra.mxu0 %v975_v25  ;;  %v434_v25 = vld [vmem:[#allocation5 + $0x720] sm:$0xff]  ;;  %v475_v12 = vrot.slane %v462_v7, %v474_v8 }
  0xb3   : > { %1104 = vmatpush1.bf16.msra.mxu1 %v1103_v26  ;;  %978 = vmatprep.subr.bf16.mxu0 %v977_v27  ;;  %v432_v26 = vld [vmem:[#allocation5 + $0x710] sm:$0xff]  ;;  %v1125_v27 = vpack.c.bf16 %v437_v20, %v433_v19  ;;  %v999_v33 = vpack.c.bf16 %v434_v25, %v430_v24 }
  0xb4   : > { %1106 = vmatprep.subr.bf16.mxu1 %v1105_v31  ;;  %v441_v31 = vld [vmem:[#allocation5 + $0x758] sm:$0xff]  ;;  %v1127_v34 = vpack.c.bf16 %v436_v28, %v432_v26 }
  0xb6   : > { %980 = vmatpush1.bf16.msra.mxu0 %v979_v37  ;;  %v442_v37 = vld [vmem:[#allocation5 + $0x760] sm:$0xff] }
  0xb7   : > { %1108 = vmatpush1.bf16.msra.mxu1 %v1107_v38  ;;  %982 = vmatprep.subr.bf16.mxu0 %v981_v39  ;;  %v440_v38 = vld [vmem:[#allocation5 + $0x750] sm:$0xff]  ;;  %v1129_v39 = vpack.c.bf16 %v445_v32, %v441_v31  ;;  %v1003_v45 = vpack.c.bf16 %v442_v37, %v438_v36 }
  0xb8   : > { %1110 = vmatprep.subr.bf16.mxu1 %v1109_v43  ;;  %v449_v43 = vld [vmem:[#allocation5 + $0x798] sm:$0xff]  ;;  %v1131_v46 = vpack.c.bf16 %v444_v40, %v440_v38 }
  0xba   : > { %984 = vmatpush1.bf16.msra.mxu0 %v983_v49  ;;  %v450_v49 = vld [vmem:[#allocation5 + $0x7a0] sm:$0xff] }
  0xbb   : > { %1112 = vmatpush1.bf16.msra.mxu1 %v1111_v50  ;;  %986 = vmatprep.subr.bf16.mxu0 %v985_v51  ;;  %v448_v50 = vld [vmem:[#allocation5 + $0x790] sm:$0xff]  ;;  %v1133_v51 = vpack.c.bf16 %v453_v44, %v449_v43  ;;  %v1007_v57 = vpack.c.bf16 %v450_v49, %v446_v48 }
  0xbc   : > { %1114 = vmatprep.subr.bf16.mxu1 %v1113_v55  ;;  %v457_v55 = vld [vmem:[#allocation5 + $0x7d8] sm:$0xff]  ;;  %v1135_v58 = vpack.c.bf16 %v452_v52, %v448_v50 }
  0xbe   : > { %988 = vmatpush1.bf16.msra.mxu0 %v987_v61  ;;  %v458_v61 = vld [vmem:[#allocation5 + $0x7e0] sm:$0xff] }
  0xbf   : > { %1116 = vmatpush1.bf16.msra.mxu1 %v1115_v62  ;;  %990 = vmatprep.subr.bf16.mxu0 %v989_v63  ;;  %v1137_v62 = vpack.c.bf16 %v461_v56, %v457_v55  ;;  %v456_v63 = vld [vmem:[#allocation5 + $0x7d0] sm:$0xff]  ;;  %v1011_v1 = vpack.c.bf16 %v458_v61, %v454_v60 }
  0xc0   : > { %1118 = vmatprep.subr.bf16.mxu1 %v1117_v3  ;;  %v1139_v2 = vpack.c.bf16 %v460_v0, %v456_v63  ;;  %v204_v3 = vld [vmem:[%s1505_s7 + $0x10] sm:$0xff] }
  0xc2   : > { %992 = vmatpush1.bf16.msra.mxu0 %v991_v9  ;;  %v470_v9 = vsub.s32 1, %v465_v5 }
  0xc3   : > { %1120 = vmatpush1.bf16.msra.mxu1 %v1119_v10  ;;  %994 = vmatprep.subr.bf16.mxu0 %v993_v11  ;;  %v478_v10 = vsub.s32 3, %v465_v5  ;;  %v467_v11 = vrot.slane %v462_v7, %v466_v6 }
  0xc4   : > { %1122 = vmatprep.subr.bf16.mxu1 %v1121_v15  ;;  %v471_v13 = vrot.slane %v462_v7, %v470_v9 }
  0xc5   : > { %v479_v14 = vrot.slane %v462_v7, %v478_v10 }
  0xc6   : > { %996 = vmatpush1.bf16.msra.mxu0 %v995_v21 }
  0xc7   : > { %1124 = vmatpush1.bf16.msra.mxu1 %v1123_v22  ;;  %998 = vmatprep.subr.bf16.mxu0 %v997_v23 }
  0xc8   : > { %1126 = vmatprep.subr.bf16.mxu1 %v1125_v27 }
  0xca   : > { %1000 = vmatpush1.bf16.msra.mxu0 %v999_v33 }
  0xcb   : > { %1128 = vmatpush1.bf16.msra.mxu1 %v1127_v34  ;;  %1002 = vmatprep.subr.bf16.mxu0 %v1001_v35 }
  0xcc   : > { %1130 = vmatprep.subr.bf16.mxu1 %v1129_v39 }
  0xce   : > { %1004 = vmatpush1.bf16.msra.mxu0 %v1003_v45 }
  0xcf   : > { %1132 = vmatpush1.bf16.msra.mxu1 %v1131_v46  ;;  %1006 = vmatprep.subr.bf16.mxu0 %v1005_v47 }
  0xd0   : > { %1134 = vmatprep.subr.bf16.mxu1 %v1133_v51 }
  0xd2   : > { %1008 = vmatpush1.bf16.msra.mxu0 %v1007_v57 }
  0xd3   : > { %1136 = vmatpush1.bf16.msra.mxu1 %v1135_v58  ;;  %1010 = vmatprep.subr.bf16.mxu0 %v1009_v59 }
  0xd4   : > { %1138 = vmatprep.subr.bf16.mxu1 %v1137_v62 }
  0xd6   : > { %1012 = vmatpush1.bf16.msra.mxu0 %v1011_v1 }
  0xd7   : > { %1140 = vmatpush1.bf16.msra.mxu1 %v1139_v2 }
  0xd9   : > { %620 = vmatmul.mubr.f32.vlgmr.msra.gmra.mrb[0].mxu0 %v204_v3 }
  0xda   : > { %762 = vmatmul.mubr.f32.vlgmr.msra.gmra.mrb[0].mxu1 %v204_v3 }
 0x1ac   : > { %v621_v15 = vpop.f32.mrb[0].mxu0 }
 0x1ad   : > { %v1141_v16 = vadd.f32 %v621_v15, %v467_v11  ;;  %v763_v17 = vpop.f32.mrb[0].mxu1  ;;  %v623_v18 = vpop.f32.mrb[1].mxu0 }
 0x1ae   : > { %v1143_v19 = vadd.f32 %v763_v17, %v475_v12  ;;  %v1142_v20 = vadd.f32 %v623_v18, %v471_v13  ;;  %v765_v21 = vpop.f32.mrb[1].mxu1 }
 0x1af   : > { %768 = vst [vmem:[%s201_s25] sm:$0xff] %v1141_v16  ;;  %v1144_v22 = vadd.f32 %v765_v21, %v479_v14 }
 0x1b0   : > { %770 = vst [vmem:[%s201_s25 + $0x10] sm:$0xff] %v1143_v19  ;;  %769 = vst [vmem:[%s201_s25 + $0x8] sm:$0xff] %v1142_v20 }
 0x1b1   : > { %771 = vst [vmem:[%s201_s25 + $0x18] sm:$0xff] %v1144_v22 }
 0x1b2   : > { %1279 = shalt.err (!%p1276_p7)
}
 0x1b3   : > { %s1280_s29 = scalar_lea.hbm %s1528_s9, 512  ;;  %s1284_s22 = scalar_lea.hbm %s1575_s3, 1024 }
 0x1b4   : > { %p1281_p9 = scmp.ne.s32.totalorder %s1528_s9, %s1280_s29  ;;  %p1285_p0 = scmp.lt.u32.totalorder %s1528_s9, %s1575_s3 }
 0x1b5   : > { %p1286_p11 = scmp.lt.u32.totalorder %s1284_s22, %s1280_s29  ;;  %p1288_p4 = scmp.lt.u32.totalorder %s1280_s29, %s1528_s9 }
 0x1b6   : > { %p1282_p2 = pnand %p1281_p9, %p1454_p12 }
 0x1b7   : > { %p1287_p1 = por %p1286_p11, %p1285_p0 }
 0x1b8   : > { %p1283_p5 = pneg %p1282_p2 }
 0x1b9   : > { %p1289_p6 = por %p1288_p4, %p1287_p1 }
 0x1bb   : > { %p1290_p8 = pnand %p1289_p6, %p1283_p5 }
 0x1bd   : > { %1293 = shalt.err (!%p1290_p8)
}
 0x1be   : > { %1155 = dma.vmem_to_hbm [thread:$0]  (%p1454_p12), %s1530_s26, 512, %s1528_s9, %s773_s16  }
 0x1bf PF: > { %s799_s18 = sand.u32 1, %s1324_s12   ;;  %p1590_p10 = scmp.ne.s32.totalorder %s1580_s19, 0 }
 0x1c0   : > { %p1591_p13 = scmp.ge.s32.totalorder %s1336_s15, 2  ;;  %s800_s20 = scalar_lea.sflag [#allocation4], %s799_s18 }
 0x1c2   : > { %p1166_p3 = pnand %p1591_p13, %p1590_p10 }
 0x1c4   : > { %1319 = dma.done.wait (!%p1166_p3), %s800_s20, 512  }
 0x1c5   : > { %1321 = vsyncadd (!%p1166_p3), %s800_s20, 4294966784  ;;  %p17_p7 = scmp.ge.s32.totalorder %s1419_s24, 4   ;;  %s1592_s12 = smov %s1328_s13 }
 0x1c6   : > { %s1593_s13 = smov %s1332_s14  ;;  %s1594_s14 = smov %s1450_s17 }
 0x1c7   : > { %s1595_s15 = smov %s1419_s24  ;;  %19 = sbr.rel (!%p17_p7) target bundleno = 6 (0x6), region = 81 }
 0x1ce   :  { %805 = vsyncpa [#allocation3], 1 }
 0x1cf   :  { %807 = vsyncpa [#allocation3 + $0x1], 1 }
 0x1d0   :  { %808 = vsyncpa [#allocation6], 1 }
 0x1d1   :  { %809 = vsyncpa [#allocation4], 1 }
 0x1d2   :  { %811 = vsyncpa [#allocation4 + $0x1], 1 }

</bundles_post_ra>
